<compile_context>
chip_gen: v6e
topology: v6e:2x2x1
jax: 0.10.0
libtpu: 0.0.40
codegen_flags: <defaults>
</compile_context>

<pallas_src>
import math
import numpy as np
import jax
import jax.numpy as jnp
from jax.experimental import pallas as pl
from jax.experimental.pallas import tpu as pltpu


ACT = "Sigmoid"
NH = 4  # number of hidden layers


def hmu(i, n, ty):
    # TODO(synk): original `hmu` definition not provided; using constant width = n.
    return n


def _round_up(x, m):
    return (x + m - 1) // m * m


# ---------------- Pallas kernel ----------------
def _make_mlp_kernel(compute_dtype, approx_sigmoid):
    def sigmoid(x):
        # exp -> EUP; reciprocal (optionally approximate) -> EUP; keeps VALU slots free.
        return pl.reciprocal(1.0 + jnp.exp(-x), approx=approx_sigmoid)

    def kernel(x_ref,
               w0_ref, b0_ref,
               w1_ref, b1_ref,
               w2_ref, b2_ref,
               w3_ref, b3_ref,
               w4_ref,
               o_ref):
        # Load biases once (values, not repeated broadcasts inside the unrolled chain).
        b0 = b0_ref[...]
        b1 = b1_ref[...]
        b2 = b2_ref[...]
        b3 = b3_ref[...]

        h = jnp.dot(x_ref[...], w0_ref[...],
                    preferred_element_type=jnp.float32) + b0

        for w_ref, b in ((w1_ref, b1), (w2_ref, b2), (w3_ref, b3)):
            h = sigmoid(h)  # f32 math
            h = jnp.dot(h.astype(compute_dtype), w_ref[...],
                        preferred_element_type=jnp.float32) + b

        h = sigmoid(h)
        o_ref[...] = jnp.dot(h.astype(compute_dtype), w4_ref[...],
                             preferred_element_type=jnp.float32).astype(o_ref.dtype)

    return kernel


# ---------------- wrapper ----------------
def mlp_forward(x, params, *, compute_dtype=jnp.float32, approx_sigmoid=False,
                block_batch=512):
    """params = [(w0,b0), (w1,b1), (w2,b2), (w3,b3), (w4,None)]; w: [in,out], b: [1,out] (f32)."""
    batch, in_dim = x.shape
    out_dim = params[-1][0].shape[1]

    # --- lane-dense padding: every feature dim -> multiple of 128 ---
    dims = [in_dim] + [w.shape[1] for w, _ in params]
    pdims = [_round_up(d, 128) for d in dims]

    # --- batch tiling: TB multiple of 8 (sublane), as large as reasonable ---
    tb = min(_round_up(batch, 8), block_batch)
    pb = _round_up(batch, tb)
    grid = (pb // tb,)

    xp = jnp.pad(x, ((0, pb - batch), (0, pdims[0] - in_dim))).astype(compute_dtype)

    flat_args = [xp]
    in_specs = [pl.BlockSpec((tb, pdims[0]), lambda i: (i, 0))]

    def _const_spec(shape):
        # Constant block index -> weights/biases stay VMEM-resident across grid steps.
        return pl.BlockSpec(shape, lambda i: (0, 0))

    for li, (w, b) in enumerate(params):
        wp = jnp.pad(w, ((0, pdims[li] - w.shape[0]),
                         (0, pdims[li + 1] - w.shape[1]))).astype(compute_dtype)
        flat_args.append(wp)
        in_specs.append(_const_spec(wp.shape))
        if b is not None:
            bp = jnp.pad(b, ((0, 0), (0, pdims[li + 1] - b.shape[1]))).astype(jnp.float32)
            flat_args.append(bp)
            in_specs.append(_const_spec(bp.shape))

    out_specs = pl.BlockSpec((tb, pdims[-1]), lambda i: (i, 0))
    out_shape = jax.ShapeDtypeStruct((pb, pdims[-1]), jnp.float32)

    # --- VMEM budget: resident params + double-buffered x/out tiles + activation headroom ---
    cbytes = jnp.dtype(compute_dtype).itemsize
    param_bytes = sum(int(np.prod(a.shape)) * a.dtype.itemsize for a in flat_args[1:])
    stream_bytes = 2 * (tb * pdims[0] * cbytes + tb * pdims[-1] * 4)
    act_bytes = 4 * tb * max(pdims) * 4
    vmem_limit = int(min(max(32 << 20, 2 * param_bytes + stream_bytes + act_bytes),
                         64 << 20))  # v7x physical VMEM is 64 MiB per core

    kernel = _make_mlp_kernel(compute_dtype, approx_sigmoid)
    out = pl.pallas_call(
        kernel,
        out_shape=out_shape,
        grid=grid,
        in_specs=in_specs,
        out_specs=out_specs,
        compiler_params=pltpu.CompilerParams(
            dimension_semantics=("parallel",),  # shard batch tiles across TCs (megacore)
            vmem_limit_bytes=vmem_limit),
    )(*flat_args)

    return out[:batch, :out_dim]


# ---------------- deterministic parameter init (PyTorch-style uniform) ----------------
def init_params(key, sizeinput, sizeoutput, n, ty):
    dims = [sizeinput] + [hmu(i, n, ty) for i in range(1, NH + 1)] + [sizeoutput]
    params = []
    for li in range(NH + 1):
        fan_in, fan_out = dims[li], dims[li + 1]
        bound = 1.0 / math.sqrt(fan_in)
        key, kw, kb = jax.random.split(key, 3)
        w = jax.random.uniform(kw, (fan_in, fan_out), jnp.float32, -bound, bound)
        if li < NH:  # last layer has bias=False
            b = jax.random.uniform(kb, (1, fan_out), jnp.float32, -bound, bound)
        else:
            b = None
        params.append((w, b))
    return params


def mlp_reference(x, params):
    h = x @ params[0][0] + params[0][1]
    for w, b in params[1:-1]:
        h = jax.nn.sigmoid(h)
        h = h @ w + b
    h = jax.nn.sigmoid(h)
    return h @ params[-1][0]


if __name__ == "__main__":
    # small shapes consistent with the module
    batch = 8
    sizeinput = 16
    sizeoutput = 8
    n = 32          # hidden width via hmu
    ty = "const"

    key = jax.random.PRNGKey(0)
    key, kx = jax.random.split(key)
    x = jax.random.normal(kx, (batch, sizeinput), jnp.float32)
    params = init_params(key, sizeinput, sizeoutput, n, ty)

    ref = jax.block_until_ready(mlp_reference(x, params))

    # f32 path (exact sigmoid) -> tight tolerance
    out_f32 = jax.block_until_ready(
        mlp_forward(x, params, compute_dtype=jnp.float32, approx_sigmoid=False))
    np.testing.assert_allclose(np.asarray(out_f32), np.asarray(ref),
                               rtol=1e-5, atol=1e-5)

    # bf16 MXU path (v6e/v7x) with approx-reciprocal sigmoid -> loose tolerance
    out_bf16 = jax.block_until_ready(
        mlp_forward(x, params, compute_dtype=jnp.bfloat16, approx_sigmoid=True))
    np.testing.assert_allclose(np.asarray(out_bf16), np.asarray(ref),
                               rtol=3e-2, atol=3e-2)

    print("KERNEL_OK")
</pallas_src>

<mosaic_0001>
module attributes {stable_mosaic.version = 11 : i64} {
  func.func @kernel(%arg0: i32, %arg1: memref<8x128xf32, #tpu.memory_space<vmem>>, %arg2: memref<128x128xf32, #tpu.memory_space<vmem>>, %arg3: memref<1x128xf32, #tpu.memory_space<vmem>>, %arg4: memref<128x128xf32, #tpu.memory_space<vmem>>, %arg5: memref<1x128xf32, #tpu.memory_space<vmem>>, %arg6: memref<128x128xf32, #tpu.memory_space<vmem>>, %arg7: memref<1x128xf32, #tpu.memory_space<vmem>>, %arg8: memref<128x128xf32, #tpu.memory_space<vmem>>, %arg9: memref<1x128xf32, #tpu.memory_space<vmem>>, %arg10: memref<128x128xf32, #tpu.memory_space<vmem>>, %arg11: memref<8x128xf32, #tpu.memory_space<vmem>>) attributes {dimension_semantics = [#tpu.dimension_semantics<parallel>], iteration_bounds = array<i64: 1>, scalar_prefetch = 0 : i64, scratch_operands = 0 : i64, tpu.core_type = #tpu.core_type<tc>, window_params = [{transform_indices = @transform_0, window_bounds = array<i64: 8, 128>}, {pipeline_mode = #tpu.pipeline_mode<synchronous>, transform_indices = @transform_1, window_bounds = array<i64: 128, 128>}, {pipeline_mode = #tpu.pipeline_mode<synchronous>, transform_indices = @transform_2, window_bounds = array<i64: 1, 128>}, {pipeline_mode = #tpu.pipeline_mode<synchronous>, transform_indices = @transform_3, window_bounds = array<i64: 128, 128>}, {pipeline_mode = #tpu.pipeline_mode<synchronous>, transform_indices = @transform_4, window_bounds = array<i64: 1, 128>}, {pipeline_mode = #tpu.pipeline_mode<synchronous>, transform_indices = @transform_5, window_bounds = array<i64: 128, 128>}, {pipeline_mode = #tpu.pipeline_mode<synchronous>, transform_indices = @transform_6, window_bounds = array<i64: 1, 128>}, {pipeline_mode = #tpu.pipeline_mode<synchronous>, transform_indices = @transform_7, window_bounds = array<i64: 128, 128>}, {pipeline_mode = #tpu.pipeline_mode<synchronous>, transform_indices = @transform_8, window_bounds = array<i64: 1, 128>}, {pipeline_mode = #tpu.pipeline_mode<synchronous>, transform_indices = @transform_9, window_bounds = array<i64: 128, 128>}, {transform_indices = @transform_10, window_bounds = array<i64: 8, 128>}]} {
    %c0 = arith.constant 0 : index
    %c0_0 = arith.constant 0 : index
    %0 = vector.load %arg3[%c0, %c0_0] : memref<1x128xf32, #tpu.memory_space<vmem>>, vector<1x128xf32>
    %c0_1 = arith.constant 0 : index
    %c0_2 = arith.constant 0 : index
    %1 = vector.load %arg5[%c0_1, %c0_2] : memref<1x128xf32, #tpu.memory_space<vmem>>, vector<1x128xf32>
    %c0_3 = arith.constant 0 : index
    %c0_4 = arith.constant 0 : index
    %2 = vector.load %arg7[%c0_3, %c0_4] : memref<1x128xf32, #tpu.memory_space<vmem>>, vector<1x128xf32>
    %c0_5 = arith.constant 0 : index
    %c0_6 = arith.constant 0 : index
    %3 = vector.load %arg9[%c0_5, %c0_6] : memref<1x128xf32, #tpu.memory_space<vmem>>, vector<1x128xf32>
    %c0_7 = arith.constant 0 : index
    %c0_8 = arith.constant 0 : index
    %4 = vector.load %arg1[%c0_7, %c0_8] : memref<8x128xf32, #tpu.memory_space<vmem>>, vector<8x128xf32>
    %c0_9 = arith.constant 0 : index
    %c0_10 = arith.constant 0 : index
    %5 = vector.load %arg2[%c0_9, %c0_10] : memref<128x128xf32, #tpu.memory_space<vmem>>, vector<128x128xf32>
    %cst = arith.constant dense<0.000000e+00> : vector<8x128xf32>
    %6 = tpu.matmul %4, %5, %cst {dimension_numbers = #tpu.dot_dimension_numbers<[1], [0], [0], [1], [0, 0, 1, 1], [], []>} : vector<8x128xf32>, vector<128x128xf32>, vector<8x128xf32> -> vector<8x128xf32>
    %7 = vector.broadcast %0 : vector<1x128xf32> to vector<8x128xf32>
    %8 = arith.addf %6, %7 : vector<8x128xf32>
    %cst_11 = arith.constant 0.000000e+00 : f32
    %9 = vector.broadcast %cst_11 : f32 to vector<8x128xf32>
    %10 = arith.subf %9, %8 : vector<8x128xf32>
    %11 = math.exp %10 : vector<8x128xf32>
    %cst_12 = arith.constant 1.000000e+00 : f32
    %12 = vector.broadcast %cst_12 : f32 to vector<8x128xf32>
    %13 = arith.addf %12, %11 : vector<8x128xf32>
    %14 = tpu.reciprocal %13 : vector<8x128xf32> -> vector<8x128xf32>
    %c0_13 = arith.constant 0 : index
    %c0_14 = arith.constant 0 : index
    %15 = vector.load %arg4[%c0_13, %c0_14] : memref<128x128xf32, #tpu.memory_space<vmem>>, vector<128x128xf32>
    %cst_15 = arith.constant dense<0.000000e+00> : vector<8x128xf32>
    %16 = tpu.matmul %14, %15, %cst_15 {dimension_numbers = #tpu.dot_dimension_numbers<[1], [0], [0], [1], [0, 0, 1, 1], [], []>} : vector<8x128xf32>, vector<128x128xf32>, vector<8x128xf32> -> vector<8x128xf32>
    %17 = vector.broadcast %1 : vector<1x128xf32> to vector<8x128xf32>
    %18 = arith.addf %16, %17 : vector<8x128xf32>
    %cst_16 = arith.constant 0.000000e+00 : f32
    %19 = vector.broadcast %cst_16 : f32 to vector<8x128xf32>
    %20 = arith.subf %19, %18 : vector<8x128xf32>
    %21 = math.exp %20 : vector<8x128xf32>
    %cst_17 = arith.constant 1.000000e+00 : f32
    %22 = vector.broadcast %cst_17 : f32 to vector<8x128xf32>
    %23 = arith.addf %22, %21 : vector<8x128xf32>
    %24 = tpu.reciprocal %23 : vector<8x128xf32> -> vector<8x128xf32>
    %c0_18 = arith.constant 0 : index
    %c0_19 = arith.constant 0 : index
    %25 = vector.load %arg6[%c0_18, %c0_19] : memref<128x128xf32, #tpu.memory_space<vmem>>, vector<128x128xf32>
    %cst_20 = arith.constant dense<0.000000e+00> : vector<8x128xf32>
    %26 = tpu.matmul %24, %25, %cst_20 {dimension_numbers = #tpu.dot_dimension_numbers<[1], [0], [0], [1], [0, 0, 1, 1], [], []>} : vector<8x128xf32>, vector<128x128xf32>, vector<8x128xf32> -> vector<8x128xf32>
    %27 = vector.broadcast %2 : vector<1x128xf32> to vector<8x128xf32>
    %28 = arith.addf %26, %27 : vector<8x128xf32>
    %cst_21 = arith.constant 0.000000e+00 : f32
    %29 = vector.broadcast %cst_21 : f32 to vector<8x128xf32>
    %30 = arith.subf %29, %28 : vector<8x128xf32>
    %31 = math.exp %30 : vector<8x128xf32>
    %cst_22 = arith.constant 1.000000e+00 : f32
    %32 = vector.broadcast %cst_22 : f32 to vector<8x128xf32>
    %33 = arith.addf %32, %31 : vector<8x128xf32>
    %34 = tpu.reciprocal %33 : vector<8x128xf32> -> vector<8x128xf32>
    %c0_23 = arith.constant 0 : index
    %c0_24 = arith.constant 0 : index
    %35 = vector.load %arg8[%c0_23, %c0_24] : memref<128x128xf32, #tpu.memory_space<vmem>>, vector<128x128xf32>
    %cst_25 = arith.constant dense<0.000000e+00> : vector<8x128xf32>
    %36 = tpu.matmul %34, %35, %cst_25 {dimension_numbers = #tpu.dot_dimension_numbers<[1], [0], [0], [1], [0, 0, 1, 1], [], []>} : vector<8x128xf32>, vector<128x128xf32>, vector<8x128xf32> -> vector<8x128xf32>
    %37 = vector.broadcast %3 : vector<1x128xf32> to vector<8x128xf32>
    %38 = arith.addf %36, %37 : vector<8x128xf32>
    %cst_26 = arith.constant 0.000000e+00 : f32
    %39 = vector.broadcast %cst_26 : f32 to vector<8x128xf32>
    %40 = arith.subf %39, %38 : vector<8x128xf32>
    %41 = math.exp %40 : vector<8x128xf32>
    %cst_27 = arith.constant 1.000000e+00 : f32
    %42 = vector.broadcast %cst_27 : f32 to vector<8x128xf32>
    %43 = arith.addf %42, %41 : vector<8x128xf32>
    %44 = tpu.reciprocal %43 : vector<8x128xf32> -> vector<8x128xf32>
    %c0_28 = arith.constant 0 : index
    %c0_29 = arith.constant 0 : index
    %45 = vector.load %arg10[%c0_28, %c0_29] : memref<128x128xf32, #tpu.memory_space<vmem>>, vector<128x128xf32>
    %cst_30 = arith.constant dense<0.000000e+00> : vector<8x128xf32>
    %46 = tpu.matmul %44, %45, %cst_30 {dimension_numbers = #tpu.dot_dimension_numbers<[1], [0], [0], [1], [0, 0, 1, 1], [], []>} : vector<8x128xf32>, vector<128x128xf32>, vector<8x128xf32> -> vector<8x128xf32>
    %c0_31 = arith.constant 0 : index
    %c0_32 = arith.constant 0 : index
    %47 = vector.load %arg11[%c0_31, %c0_32] : memref<8x128xf32, #tpu.memory_space<vmem>>, vector<8x128xf32>
    tpu.vector_store %arg11[%c0_31, %c0_32], %46 {strides = array<i32>} : memref<8x128xf32, #tpu.memory_space<vmem>>, vector<8x128xf32>,
    return
  }
  func.func @transform_0(%arg0: i32) -> (i32, i32) {
    %c0_i32 = arith.constant 0 : i32
    %c0_i32_0 = arith.constant 0 : i32
    return %arg0, %c0_i32 : i32, i32
  }
  func.func @transform_1(%arg0: i32) -> (i32, i32) {
    %c0_i32 = arith.constant 0 : i32
    %c0_i32_0 = arith.constant 0 : i32
    %c0_i32_1 = arith.constant 0 : i32
    return %c0_i32, %c0_i32_0 : i32, i32
  }
  func.func @transform_2(%arg0: i32) -> (i32, i32) {
    %c0_i32 = arith.constant 0 : i32
    %c0_i32_0 = arith.constant 0 : i32
    %c0_i32_1 = arith.constant 0 : i32
    return %c0_i32, %c0_i32_0 : i32, i32
  }
  func.func @transform_3(%arg0: i32) -> (i32, i32) {
    %c0_i32 = arith.constant 0 : i32
    %c0_i32_0 = arith.constant 0 : i32
    %c0_i32_1 = arith.constant 0 : i32
    return %c0_i32, %c0_i32_0 : i32, i32
  }
  func.func @transform_4(%arg0: i32) -> (i32, i32) {
    %c0_i32 = arith.constant 0 : i32
    %c0_i32_0 = arith.constant 0 : i32
    %c0_i32_1 = arith.constant 0 : i32
    return %c0_i32, %c0_i32_0 : i32, i32
  }
  func.func @transform_5(%arg0: i32) -> (i32, i32) {
    %c0_i32 = arith.constant 0 : i32
    %c0_i32_0 = arith.constant 0 : i32
    %c0_i32_1 = arith.constant 0 : i32
    return %c0_i32, %c0_i32_0 : i32, i32
  }
  func.func @transform_6(%arg0: i32) -> (i32, i32) {
    %c0_i32 = arith.constant 0 : i32
    %c0_i32_0 = arith.constant 0 : i32
    %c0_i32_1 = arith.constant 0 : i32
    return %c0_i32, %c0_i32_0 : i32, i32
  }
  func.func @transform_7(%arg0: i32) -> (i32, i32) {
    %c0_i32 = arith.constant 0 : i32
    %c0_i32_0 = arith.constant 0 : i32
    %c0_i32_1 = arith.constant 0 : i32
    return %c0_i32, %c0_i32_0 : i32, i32
  }
  func.func @transform_8(%arg0: i32) -> (i32, i32) {
    %c0_i32 = arith.constant 0 : i32
    %c0_i32_0 = arith.constant 0 : i32
    %c0_i32_1 = arith.constant 0 : i32
    return %c0_i32, %c0_i32_0 : i32, i32
  }
  func.func @transform_9(%arg0: i32) -> (i32, i32) {
    %c0_i32 = arith.constant 0 : i32
    %c0_i32_0 = arith.constant 0 : i32
    %c0_i32_1 = arith.constant 0 : i32
    return %c0_i32, %c0_i32_0 : i32, i32
  }
  func.func @transform_10(%arg0: i32) -> (i32, i32) {
    %c0_i32 = arith.constant 0 : i32
    %c0_i32_0 = arith.constant 0 : i32
    return %arg0, %c0_i32 : i32, i32
  }
}

</mosaic_0001>

<bundles_post_ra>
// kernel: tpu_custom_call.1
= control target key start
LH: loop header
LB: loop body
LE: loop exit
PB: predicated region body
PF: predicated region fallthrough
CT: control target
= control target key end

     0   :  { %15 = vsyncpa [#allocation3], 0  ;;  %s1259_s0 = inlined_call_operand.hbm [shape: f32[8,128], index: 0, kind: input, shape index: {}]   ;;  %s1260_s1 = inlined_call_operand.hbm [shape: f32[128,128], index: 1, kind: input, shape index: {}]   ;;  %s1261_s2 = inlined_call_operand.vmem [shape: f32[1,128], index: 2, kind: input, shape index: {}]   ;;  %s1262_s3 = inlined_call_operand.hbm [shape: f32[128,128], index: 3, kind: input, shape index: {}]   ;;  %s1263_s4 = inlined_call_operand.vmem [shape: f32[1,128], index: 4, kind: input, shape index: {}]   ;;  %s1264_s5 = inlined_call_operand.hbm [shape: f32[128,128], index: 5, kind: input, shape index: {}]   ;;  %s1265_s6 = inlined_call_operand.vmem [shape: f32[1,128], index: 6, kind: input, shape index: {}]   ;;  %s1266_s7 = inlined_call_operand.hbm [shape: f32[128,128], index: 7, kind: input, shape index: {}]   ;;  %s1267_s8 = inlined_call_operand.vmem [shape: f32[1,128], index: 8, kind: input, shape index: {}]   ;;  %s1268_s9 = inlined_call_operand.hbm [shape: f32[128,128], index: 9, kind: input, shape index: {}]   ;;  %s1269_s10 = inlined_call_operand.hbm [shape: f32[8,128], index: 10, kind: output, shape index: {}]  }
   0x1   :  { %16 = vsyncpa [#allocation6], 0 }
   0x2   :  { %17 = vsyncpa [#allocation9], 0 }
   0x3   :  { %18 = vsyncpa [#allocation12], 0 }
   0x4   :  { %19 = vsyncpa [#allocation4], 0  ;;  %s1055_s13 = smov [#allocation5]  }
   0x5   :  { %s35_s14 = sshll.u32 %s1055_s13, 4  ;;  %s36_s14 = int_to_ptr.vmem [resolvable:$true] %s35_s14 }
   0x6   :  { %s913_s15 = scalar_lea.vmem %s36_s14, 2048  ;;  %p918_p1 = scmp.lt.s32.totalorder %s36_s14, %s36_s14 }
   0x7   :  { %p914_p0 = scmp.ne.s32.totalorder %s36_s14, %s913_s15  ;;  %p919_p2 = scmp.lt.s32.totalorder %s913_s15, %s913_s15 }
   0x9   :  { %p920_p3 = por %p919_p2, %p918_p1 }
   0xb   :  { %p921_p4 = pnand %p920_p3, %p914_p0 }
   0xd   :  { %924 = shalt.err (!%p921_p4)
}
   0xe   :  { %s1056_s16 = smov 128   ;;  %s1057_s17 = smov 8  }
   0xf   :  { %41 = dma.hbm_to_vmem [thread:$0]  %s1260_s1, 2048, %s36_s14, [#allocation6], %s1056_s16, %s1056_s16, %s1057_s17  }
  0x10   :  { %s1058_s20 = smov [#allocation8]   ;;  %s1059_s22 = smov [#allocation2]  }
  0x11   :  { %s63_s21 = sshll.u32 %s1058_s20, 4  ;;  %s26_s23 = sshll.u32 %s1059_s22, 4  ;;  %s64_s21 = int_to_ptr.vmem [resolvable:$true] %s63_s21  ;;  %s27_s23 = int_to_ptr.vmem [resolvable:$true] %s26_s23 }
  0x12   :  { %s933_s24 = scalar_lea.vmem %s64_s21, 2048  ;;  %p938_p6 = scmp.lt.s32.totalorder %s64_s21, %s64_s21 }
  0x13   :  { %p934_p5 = scmp.ne.s32.totalorder %s64_s21, %s933_s24  ;;  %p939_p7 = scmp.lt.s32.totalorder %s933_s24, %s933_s24 }
  0x15   :  { %p940_p8 = por %p939_p7, %p938_p6 }
  0x17   :  { %p941_p9 = pnand %p940_p8, %p934_p5 }
  0x19   :  { %944 = shalt.err (!%p941_p9)
}
  0x1a   :  { %69 = dma.hbm_to_vmem [thread:$0]  %s1264_s5, 2048, %s64_s21, [#allocation9], %s1056_s16, %s1056_s16, %s1057_s17  }
  0x1b   :  { %s953_s1 = scalar_lea.vmem %s27_s23, 128  ;;  %p958_p11 = scmp.lt.s32.totalorder %s27_s23, %s27_s23 }
  0x1c   :  { %p954_p10 = scmp.ne.s32.totalorder %s27_s23, %s953_s1  ;;  %p959_p12 = scmp.lt.s32.totalorder %s953_s1, %s953_s1 }
  0x1e   :  { %p960_p13 = por %p959_p12, %p958_p11 }
  0x20   :  { %p961_p0 = pnand %p960_p13, %p954_p10 }
  0x22   :  { %964 = shalt.err (!%p961_p0)
}
  0x23   :  { %29 = dma.hbm_to_vmem [thread:$0]  %s1259_s0, 128, %s27_s23, [#allocation3]  }
  0x24   :  { %s1060_s29 = smov [#allocation7]   ;;  %s1061_s11 = smov [#allocation10]  }
  0x25   :  { %s49_s30 = sshll.u32 %s1060_s29, 4  ;;  %s77_s12 = sshll.u32 %s1061_s11, 4  ;;  %s50_s30 = int_to_ptr.vmem [resolvable:$true] %s49_s30  ;;  %s78_s12 = int_to_ptr.vmem [resolvable:$true] %s77_s12 }
  0x26   :  { %s973_s13 = scalar_lea.vmem %s50_s30, 2048  ;;  %p978_p2 = scmp.lt.s32.totalorder %s50_s30, %s50_s30 }
  0x27   :  { %p974_p1 = scmp.ne.s32.totalorder %s50_s30, %s973_s13  ;;  %p979_p3 = scmp.lt.s32.totalorder %s973_s13, %s973_s13 }
  0x29   :  { %p980_p4 = por %p979_p3, %p978_p2 }
  0x2b   :  { %p981_p5 = pnand %p980_p4, %p974_p1 }
  0x2d   :  { %984 = shalt.err (!%p981_p5)
}
  0x2e   :  { %55 = dma.hbm_to_vmem [thread:$0]  %s1262_s3, 2048, %s50_s30, [#allocation6], %s1056_s16, %s1056_s16, %s1057_s17  }
  0x2f   :  { %s993_s0 = scalar_lea.vmem %s78_s12, 2048  ;;  %p998_p7 = scmp.lt.s32.totalorder %s78_s12, %s78_s12 }
  0x30   :  { %p994_p6 = scmp.ne.s32.totalorder %s78_s12, %s993_s0  ;;  %p999_p8 = scmp.lt.s32.totalorder %s993_s0, %s993_s0 }
  0x32   :  { %p1000_p9 = por %p999_p8, %p998_p7 }
  0x34   :  { %p1001_p10 = pnand %p1000_p9, %p994_p6 }
  0x36   :  { %1004 = shalt.err (!%p1001_p10)
}
  0x37   :  { %83 = dma.hbm_to_vmem [thread:$0]  %s1266_s7, 2048, %s78_s12, [#allocation9], %s1056_s16, %s1056_s16, %s1057_s17  }
  0x38   :  { %s1062_s19 = smov [#allocation11]  }
  0x39   :  { %s91_s20 = sshll.u32 %s1062_s19, 4  ;;  %s92_s20 = int_to_ptr.vmem [resolvable:$true] %s91_s20 }
  0x3a   :  { %s1013_s21 = scalar_lea.vmem %s92_s20, 2048  ;;  %p1018_p12 = scmp.lt.s32.totalorder %s92_s20, %s92_s20 }
  0x3b   :  { %p1014_p11 = scmp.ne.s32.totalorder %s92_s20, %s1013_s21  ;;  %p1019_p13 = scmp.lt.s32.totalorder %s1013_s21, %s1013_s21 }
  0x3d   :  { %p1020_p0 = por %p1019_p13, %p1018_p12 }
  0x3f   :  { %p1021_p1 = pnand %p1020_p0, %p1014_p11 }
  0x41   :  { %1024 = shalt.err (!%p1021_p1)
}
  0x42   :  { %97 = dma.hbm_to_vmem [thread:$0]  %s1268_s9, 2048, %s92_s20, [#allocation12], %s1056_s16, %s1056_s16, %s1057_s17  }
  0x43   :  { %1045 = dma.done.wait [#allocation3], 128  }
  0x44   :  { %1046 = vsyncadd [#allocation3], 4294967168 }
  0x45   :  { %1047 = dma.done.wait [#allocation6], 4096  }
  0x46   :  { %1048 = vsyncadd [#allocation6], 4294963200 }
  0x47   :  { %1049 = dma.done.wait [#allocation9], 4096  }
  0x48   :  { %1050 = vsyncadd [#allocation9], 4294963200 }
  0x49   :  { %1051 = dma.done.wait [#allocation12], 2048  }
  0x4a   :  { %1052 = vsyncadd [#allocation12], 4294965248  ;;  %v1063_v0 = vmov 0.0   ;;  %vm1064_vm0 = vmmov 0   ;;  %v136_v1 = vld [vmem:[#allocation5 + $0x78] sm:$0xff]  ;;  %v135_v2 = vld [vmem:[#allocation5 + $0x70] sm:$0xff] }
  0x4b   :  { %703 = vmatprep.subr.mxu0 %v1063_v0  ;;  %735 = vmatprep.mubr.msk.f32.mxu0 %vm1064_vm0, %v1063_v0  ;;  %v134_v3 = vld [vmem:[#allocation5 + $0x68] sm:$0xff]  ;;  %v133_v4 = vld [vmem:[#allocation5 + $0x60] sm:$0xff]  ;;  %v132_v5 = vld [vmem:[#allocation5 + $0x58] sm:$0xff]  ;;  %s1065_s24 = smov [#allocation13]  }
  0x4c   :  { %738 = vmatprep.subr.mxu1 %v1063_v0  ;;  %770 = vmatprep.mubr.msk.f32.mxu1 %vm1064_vm0, %v1063_v0  ;;  %v131_v6 = vld [vmem:[#allocation5 + $0x50] sm:$0xff]  ;;  %v130_v7 = vld [vmem:[#allocation5 + $0x48] sm:$0xff]  ;;  %v129_v8 = vld [vmem:[#allocation5 + $0x40] sm:$0xff]  ;;  %s602_s25 = sshll.u32 %s1065_s24, 4  ;;  %s603_s25 = int_to_ptr.vmem [resolvable:$true] %s602_s25 }
  0x4d   :  { %704 = vmatpush3.msra.mxu0 %v136_v1  ;;  %v128_v9 = vld [vmem:[#allocation5 + $0x38] sm:$0xff]  ;;  %v127_v10 = vld [vmem:[#allocation5 + $0x30] sm:$0xff]  ;;  %v126_v11 = vld [vmem:[#allocation5 + $0x28] sm:$0xff]  ;;  %s1025_s26 = scalar_lea.vmem %s603_s25, 128  ;;  %p1030_p3 = scmp.lt.s32.totalorder %s603_s25, %s603_s25 }
  0x4e   :  { %705 = vmatprep.subr.mxu0 %v1063_v0  ;;  %v125_v12 = vld [vmem:[#allocation5 + $0x20] sm:$0xff]  ;;  %v124_v13 = vld [vmem:[#allocation5 + $0x18] sm:$0xff]  ;;  %v123_v14 = vld [vmem:[#allocation5 + $0x10] sm:$0xff]  ;;  %p1026_p2 = scmp.ne.s32.totalorder %s603_s25, %s1025_s26  ;;  %p1031_p4 = scmp.lt.s32.totalorder %s1025_s26, %s1025_s26 }
  0x4f   :  { %706 = vmatpush3.msra.mxu0 %v135_v2  ;;  %v122_v15 = vld [vmem:[#allocation5 + $0x8] sm:$0xff]  ;;  %v121_v16 = vld [vmem:[#allocation5] sm:$0xff]  ;;  %v120_v17 = vld [vmem:[#allocation2] sm:$0xff] }
  0x50   :  { %707 = vmatprep.subr.mxu0 %v1063_v0  ;;  %v233_v18 = vld [vmem:[#allocation7 + $0x78] sm:$0xff]  ;;  %v232_v19 = vld [vmem:[#allocation7 + $0x70] sm:$0xff]  ;;  %v231_v20 = vld [vmem:[#allocation7 + $0x68] sm:$0xff]  ;;  %p1032_p5 = por %p1031_p4, %p1030_p3 }
  0x51   :  { %708 = vmatpush3.msra.mxu0 %v134_v3  ;;  %739 = vmatpush3.msra.mxu1 %v233_v18  ;;  %v230_v21 = vld [vmem:[#allocation7 + $0x60] sm:$0xff]  ;;  %v229_v22 = vld [vmem:[#allocation7 + $0x58] sm:$0xff]  ;;  %v228_v23 = vld [vmem:[#allocation7 + $0x50] sm:$0xff] }
  0x52   :  { %709 = vmatprep.subr.mxu0 %v1063_v0  ;;  %740 = vmatprep.subr.mxu1 %v1063_v0  ;;  %v227_v24 = vld [vmem:[#allocation7 + $0x48] sm:$0xff]  ;;  %v226_v25 = vld [vmem:[#allocation7 + $0x40] sm:$0xff]  ;;  %v225_v26 = vld [vmem:[#allocation7 + $0x38] sm:$0xff]  ;;  %p1033_p6 = pnand %p1032_p5, %p1026_p2 }
  0x53   :  { %710 = vmatpush3.msra.mxu0 %v133_v4  ;;  %741 = vmatpush3.msra.mxu1 %v232_v19  ;;  %v224_v27 = vld [vmem:[#allocation7 + $0x30] sm:$0xff]  ;;  %v223_v28 = vld [vmem:[#allocation7 + $0x28] sm:$0xff]  ;;  %v222_v29 = vld [vmem:[#allocation7 + $0x20] sm:$0xff] }
  0x54   :  { %711 = vmatprep.subr.mxu0 %v1063_v0  ;;  %742 = vmatprep.subr.mxu1 %v1063_v0  ;;  %v221_v30 = vld [vmem:[#allocation7 + $0x18] sm:$0xff]  ;;  %v220_v31 = vld [vmem:[#allocation7 + $0x10] sm:$0xff]  ;;  %v219_v32 = vld [vmem:[#allocation7 + $0x8] sm:$0xff] }
  0x55   :  { %712 = vmatpush3.msra.mxu0 %v132_v5  ;;  %743 = vmatpush3.msra.mxu1 %v231_v20  ;;  %v218_v33 = vld [vmem:[#allocation7] sm:$0xff]  ;;  %v614_v34 = vld [vmem:[%s1261_s2] ss:$0 sm:$0xff]  ;;  %v329_v44 = vld [vmem:[#allocation8 + $0x70] sm:$0xff] }
  0x56   :  { %713 = vmatprep.subr.mxu0 %v1063_v0  ;;  %744 = vmatprep.subr.mxu1 %v1063_v0  ;;  %v330_v43 = vld [vmem:[#allocation8 + $0x78] sm:$0xff]  ;;  %v328_v45 = vld [vmem:[#allocation8 + $0x68] sm:$0xff]  ;;  %v327_v46 = vld [vmem:[#allocation8 + $0x60] sm:$0xff] }
  0x57   :  { %714 = vmatpush3.msra.mxu0 %v131_v6  ;;  %745 = vmatpush3.msra.mxu1 %v230_v21  ;;  %v326_v47 = vld [vmem:[#allocation8 + $0x58] sm:$0xff]  ;;  %v325_v48 = vld [vmem:[#allocation8 + $0x50] sm:$0xff]  ;;  %v324_v49 = vld [vmem:[#allocation8 + $0x48] sm:$0xff] }
  0x58   :  { %715 = vmatprep.subr.mxu0 %v1063_v0  ;;  %746 = vmatprep.subr.mxu1 %v1063_v0  ;;  %v323_v50 = vld [vmem:[#allocation8 + $0x40] sm:$0xff]  ;;  %v322_v51 = vld [vmem:[#allocation8 + $0x38] sm:$0xff]  ;;  %v321_v52 = vld [vmem:[#allocation8 + $0x30] sm:$0xff] }
  0x59   :  { %716 = vmatpush3.msra.mxu0 %v130_v7  ;;  %747 = vmatpush3.msra.mxu1 %v229_v22  ;;  %v320_v53 = vld [vmem:[#allocation8 + $0x28] sm:$0xff]  ;;  %v319_v54 = vld [vmem:[#allocation8 + $0x20] sm:$0xff]  ;;  %v318_v55 = vld [vmem:[#allocation8 + $0x18] sm:$0xff] }
  0x5a   :  { %717 = vmatprep.subr.mxu0 %v1063_v0  ;;  %748 = vmatprep.subr.mxu1 %v1063_v0  ;;  %v317_v56 = vld [vmem:[#allocation8 + $0x10] sm:$0xff]  ;;  %v316_v57 = vld [vmem:[#allocation8 + $0x8] sm:$0xff]  ;;  %v315_v58 = vld [vmem:[#allocation8] sm:$0xff] }
  0x5b   :  { %718 = vmatpush3.msra.mxu0 %v129_v8  ;;  %749 = vmatpush3.msra.mxu1 %v228_v23  ;;  %v615_v59 = vld [vmem:[%s1263_s4] ss:$0 sm:$0xff]  ;;  %v426_v6 = vld [vmem:[#allocation10 + $0x70] sm:$0xff]  ;;  %v425_v7 = vld [vmem:[#allocation10 + $0x68] sm:$0xff] }
  0x5c   :  { %719 = vmatprep.subr.mxu0 %v1063_v0  ;;  %750 = vmatprep.subr.mxu1 %v1063_v0  ;;  %v427_v5 = vld [vmem:[#allocation10 + $0x78] sm:$0xff]  ;;  %v424_v8 = vld [vmem:[#allocation10 + $0x60] sm:$0xff]  ;;  %v414_v18 = vld [vmem:[#allocation10 + $0x10] sm:$0xff] }
  0x5d   :  { %720 = vmatpush3.msra.mxu0 %v128_v9  ;;  %751 = vmatpush3.msra.mxu1 %v227_v24  ;;  %v423_v9 = vld [vmem:[#allocation10 + $0x58] sm:$0xff]  ;;  %v413_v19 = vld [vmem:[#allocation10 + $0x8] sm:$0xff]  ;;  %v412_v20 = vld [vmem:[#allocation10] sm:$0xff] }
  0x5e   :  { %721 = vmatprep.subr.mxu0 %v1063_v0  ;;  %752 = vmatprep.subr.mxu1 %v1063_v0  ;;  %v616_v21 = vld [vmem:[%s1265_s6] ss:$0 sm:$0xff] }
  0x5f   :  { %722 = vmatpush3.msra.mxu0 %v127_v10  ;;  %753 = vmatpush3.msra.mxu1 %v226_v25  ;;  %v422_v10 = vld [vmem:[#allocation10 + $0x50] sm:$0xff] }
  0x60   :  { %723 = vmatprep.subr.mxu0 %v1063_v0  ;;  %754 = vmatprep.subr.mxu1 %v1063_v0 }
  0x61   :  { %724 = vmatpush3.msra.mxu0 %v126_v11  ;;  %755 = vmatpush3.msra.mxu1 %v225_v26  ;;  %v421_v11 = vld [vmem:[#allocation10 + $0x48] sm:$0xff] }
  0x62   :  { %725 = vmatprep.subr.mxu0 %v1063_v0  ;;  %756 = vmatprep.subr.mxu1 %v1063_v0 }
  0x63   :  { %726 = vmatpush3.msra.mxu0 %v125_v12  ;;  %757 = vmatpush3.msra.mxu1 %v224_v27  ;;  %v420_v12 = vld [vmem:[#allocation10 + $0x40] sm:$0xff] }
  0x64   :  { %727 = vmatprep.subr.mxu0 %v1063_v0  ;;  %758 = vmatprep.subr.mxu1 %v1063_v0 }
  0x65   :  { %728 = vmatpush3.msra.mxu0 %v124_v13  ;;  %759 = vmatpush3.msra.mxu1 %v223_v28  ;;  %v419_v13 = vld [vmem:[#allocation10 + $0x38] sm:$0xff] }
  0x66   :  { %729 = vmatprep.subr.mxu0 %v1063_v0  ;;  %760 = vmatprep.subr.mxu1 %v1063_v0 }
  0x67   :  { %730 = vmatpush3.msra.mxu0 %v123_v14  ;;  %761 = vmatpush3.msra.mxu1 %v222_v29  ;;  %v418_v14 = vld [vmem:[#allocation10 + $0x30] sm:$0xff] }
  0x68   :  { %731 = vmatprep.subr.mxu0 %v1063_v0  ;;  %762 = vmatprep.subr.mxu1 %v1063_v0 }
  0x69   :  { %732 = vmatpush3.msra.mxu0 %v122_v15  ;;  %763 = vmatpush3.msra.mxu1 %v221_v30  ;;  %v417_v15 = vld [vmem:[#allocation10 + $0x28] sm:$0xff]  ;;  %v524_v30 = vld [vmem:[#allocation11 + $0x78] sm:$0xff] }
  0x6a   :  { %733 = vmatprep.subr.mxu0 %v1063_v0  ;;  %764 = vmatprep.subr.mxu1 %v1063_v0 }
  0x6b   :  { %734 = vmatpush3.msra.mxu0 %v121_v16  ;;  %765 = vmatpush3.msra.mxu1 %v220_v31  ;;  %v416_v16 = vld [vmem:[#allocation10 + $0x20] sm:$0xff]  ;;  %v523_v31 = vld [vmem:[#allocation11 + $0x70] sm:$0xff] }
  0x6c   :  { %736 = vmatmul.mubr.f32.vlgmr.msra.gmra.mxu0 %v120_v17  ;;  %773 = vmatprep.subr.mxu0 %v1063_v0  ;;  %v415_v17 = vld [vmem:[#allocation10 + $0x18] sm:$0xff] }
  0x6d   :  { %805 = vmatprep.mubr.msk.f32.mxu0 %vm1064_vm0, %v1063_v0  ;;  %766 = vmatprep.subr.mxu1 %v1063_v0 }
  0x6e   :  { %767 = vmatpush3.msra.mxu1 %v219_v32  ;;  %774 = vmatpush3.msra.mxu0 %v330_v43  ;;  %v522_v32 = vld [vmem:[#allocation11 + $0x68] sm:$0xff]  ;;  %v511_v43 = vld [vmem:[#allocation11 + $0x10] sm:$0xff] }
  0x6f   :  { %768 = vmatprep.subr.mxu1 %v1063_v0  ;;  %775 = vmatprep.subr.mxu0 %v1063_v0 }
  0x70   :  { %769 = vmatpush3.msra.mxu1 %v218_v33  ;;  %776 = vmatpush3.msra.mxu0 %v329_v44  ;;  %v521_v33 = vld [vmem:[#allocation11 + $0x60] sm:$0xff]  ;;  %v510_v44 = vld [vmem:[#allocation11 + $0x8] sm:$0xff] }
  0x71   :  { %808 = vmatprep.subr.mxu1 %v1063_v0  ;;  %777 = vmatprep.subr.mxu0 %v1063_v0 }
  0x72   :  { %778 = vmatpush3.msra.mxu0 %v328_v45  ;;  %v509_v45 = vld [vmem:[#allocation11] sm:$0xff] }
  0x73   :  { %779 = vmatprep.subr.mxu0 %v1063_v0 }
  0x74   :  { %780 = vmatpush3.msra.mxu0 %v327_v46  ;;  %v617_v46 = vld [vmem:[%s1267_s8] ss:$0 sm:$0xff] }
  0x75   :  { %781 = vmatprep.subr.mxu0 %v1063_v0 }
  0x76   :  { %782 = vmatpush3.msra.mxu0 %v326_v47 }
  0x77   :  { %783 = vmatprep.subr.mxu0 %v1063_v0 }
  0x78   :  { %784 = vmatpush3.msra.mxu0 %v325_v48 }
  0x79   :  { %785 = vmatprep.subr.mxu0 %v1063_v0 }
  0x7a   :  { %786 = vmatpush3.msra.mxu0 %v324_v49 }
  0x7b   :  { %787 = vmatprep.subr.mxu0 %v1063_v0 }
  0x7c   :  { %788 = vmatpush3.msra.mxu0 %v323_v50 }
  0x7d   :  { %789 = vmatprep.subr.mxu0 %v1063_v0 }
  0x7e   :  { %790 = vmatpush3.msra.mxu0 %v322_v51 }
  0x7f   :  { %791 = vmatprep.subr.mxu0 %v1063_v0 }
  0x80   :  { %792 = vmatpush3.msra.mxu0 %v321_v52 }
  0x81   :  { %793 = vmatprep.subr.mxu0 %v1063_v0 }
  0x82   :  { %794 = vmatpush3.msra.mxu0 %v320_v53 }
  0x83   :  { %795 = vmatprep.subr.mxu0 %v1063_v0 }
  0x84   :  { %796 = vmatpush3.msra.mxu0 %v319_v54 }
  0x85   :  { %797 = vmatprep.subr.mxu0 %v1063_v0 }
  0x86   :  { %798 = vmatpush3.msra.mxu0 %v318_v55 }
  0x87   :  { %799 = vmatprep.subr.mxu0 %v1063_v0 }
  0x88   :  { %800 = vmatpush3.msra.mxu0 %v317_v56 }
  0x89   :  { %801 = vmatprep.subr.mxu0 %v1063_v0 }
  0x8a   :  { %802 = vmatpush3.msra.mxu0 %v316_v57 }
  0x8b   :  { %803 = vmatprep.subr.mxu0 %v1063_v0 }
  0x8c   :  { %804 = vmatpush3.msra.mxu0 %v315_v58 }
  0x8d   :  { %843 = vmatprep.subr.mxu0 %v1063_v0 }
 0x12c   :  { %v209_v35 = vpop.f32.mrf.mxu0 }
 0x12d   :  { %v210_v36 = vadd.f32 %v614_v34, %v209_v35  ;;  %v520_v34 = vld [vmem:[#allocation11 + $0x58] sm:$0xff]  ;;  %v519_v35 = vld [vmem:[#allocation11 + $0x50] sm:$0xff] }
 0x12e   :  { %v737_v37 = vpop.f32.mrf.mxu0 }
 0x12f   :  { %v213_v38 = vsub.f32 0.0, %v210_v36  ;;  %v518_v36 = vld [vmem:[#allocation11 + $0x48] sm:$0xff]  ;;  %v517_v37 = vld [vmem:[#allocation11 + $0x40] sm:$0xff] }
 0x131   :  { %v214_v39 = vmul.f32 1.442695, %v213_v38  ;;  %v516_v38 = vld [vmem:[#allocation11 + $0x38] sm:$0xff] }
 0x133   :  { %889 = vpow2.f32 %v214_v39  ;;  %v515_v39 = vld [vmem:[#allocation11 + $0x30] sm:$0xff] }
 0x140   :  { %v890_v40 = vpop.eup %889 }
 0x141   :  { %v216_v41 = vadd.f32 1.0, %v890_v40  ;;  %v514_v40 = vld [vmem:[#allocation11 + $0x28] sm:$0xff] }
 0x143   :  { %891 = vrcp.f32 %v216_v41  ;;  %v513_v41 = vld [vmem:[#allocation11 + $0x20] sm:$0xff] }
 0x150   :  { %v892_v42 = vpop.eup %891 }
 0x151   :  { %771 = vmatmul.mubr.f32.vlgmr.msra.gmra.mxu1 %v892_v42  ;;  %v512_v42 = vld [vmem:[#allocation11 + $0x18] sm:$0xff] }
 0x152   :  { %840 = vmatprep.mubr.msk.f32.mxu1 %vm1064_vm0, %v1063_v0  ;;  %809 = vmatpush3.msra.mxu1 %v427_v5 }
 0x153   :  { %810 = vmatprep.subr.mxu1 %v1063_v0 }
 0x154   :  { %811 = vmatpush3.msra.mxu1 %v426_v6 }
 0x155   :  { %812 = vmatprep.subr.mxu1 %v1063_v0 }
 0x156   :  { %813 = vmatpush3.msra.mxu1 %v425_v7 }
 0x157   :  { %814 = vmatprep.subr.mxu1 %v1063_v0 }
 0x158   :  { %815 = vmatpush3.msra.mxu1 %v424_v8 }
 0x159   :  { %816 = vmatprep.subr.mxu1 %v1063_v0 }
 0x15a   :  { %817 = vmatpush3.msra.mxu1 %v423_v9 }
 0x15b   :  { %818 = vmatprep.subr.mxu1 %v1063_v0 }
 0x15c   :  { %819 = vmatpush3.msra.mxu1 %v422_v10 }
 0x15d   :  { %820 = vmatprep.subr.mxu1 %v1063_v0 }
 0x15e   :  { %821 = vmatpush3.msra.mxu1 %v421_v11 }
 0x15f   :  { %822 = vmatprep.subr.mxu1 %v1063_v0 }
 0x160   :  { %823 = vmatpush3.msra.mxu1 %v420_v12 }
 0x161   :  { %824 = vmatprep.subr.mxu1 %v1063_v0 }
 0x162   :  { %825 = vmatpush3.msra.mxu1 %v419_v13 }
 0x163   :  { %826 = vmatprep.subr.mxu1 %v1063_v0 }
 0x164   :  { %827 = vmatpush3.msra.mxu1 %v418_v14 }
 0x165   :  { %828 = vmatprep.subr.mxu1 %v1063_v0 }
 0x166   :  { %829 = vmatpush3.msra.mxu1 %v417_v15 }
 0x167   :  { %830 = vmatprep.subr.mxu1 %v1063_v0 }
 0x168   :  { %831 = vmatpush3.msra.mxu1 %v416_v16 }
 0x169   :  { %832 = vmatprep.subr.mxu1 %v1063_v0 }
 0x16a   :  { %833 = vmatpush3.msra.mxu1 %v415_v17 }
 0x16b   :  { %834 = vmatprep.subr.mxu1 %v1063_v0 }
 0x16c   :  { %835 = vmatpush3.msra.mxu1 %v414_v18 }
 0x16d   :  { %836 = vmatprep.subr.mxu1 %v1063_v0 }
 0x16e   :  { %837 = vmatpush3.msra.mxu1 %v413_v19 }
 0x16f   :  { %838 = vmatprep.subr.mxu1 %v1063_v0 }
 0x170   :  { %839 = vmatpush3.msra.mxu1 %v412_v20 }
 0x211   :  { %v306_v60 = vpop.f32.mrf.mxu1 }
 0x212   :  { %v307_v61 = vadd.f32 %v615_v59, %v306_v60 }
 0x213   :  { %v772_v62 = vpop.f32.mrf.mxu1 }
 0x214   :  { %v310_v63 = vsub.f32 0.0, %v307_v61 }
 0x216   :  { %v311_v1 = vmul.f32 1.442695, %v310_v63 }
 0x218   :  { %893 = vpow2.f32 %v311_v1 }
 0x225   :  { %v894_v2 = vpop.eup %893 }
 0x226   :  { %v313_v3 = vadd.f32 1.0, %v894_v2 }
 0x228   :  { %895 = vrcp.f32 %v313_v3 }
 0x235   :  { %v896_v4 = vpop.eup %895 }
 0x236   :  { %806 = vmatmul.mubr.f32.vlgmr.msra.gmra.mxu0 %v896_v4 }
 0x237   :  { %875 = vmatprep.mubr.msk.f32.mxu0 %vm1064_vm0, %v1063_v0  ;;  %844 = vmatpush3.msra.mxu0 %v524_v30 }
 0x238   :  { %845 = vmatprep.subr.mxu0 %v1063_v0 }
 0x239   :  { %846 = vmatpush3.msra.mxu0 %v523_v31 }
 0x23a   :  { %847 = vmatprep.subr.mxu0 %v1063_v0 }
 0x23b   :  { %848 = vmatpush3.msra.mxu0 %v522_v32 }
 0x23c   :  { %849 = vmatprep.subr.mxu0 %v1063_v0 }
 0x23d   :  { %850 = vmatpush3.msra.mxu0 %v521_v33 }
 0x23e   :  { %851 = vmatprep.subr.mxu0 %v1063_v0 }
 0x23f   :  { %852 = vmatpush3.msra.mxu0 %v520_v34 }
 0x240   :  { %853 = vmatprep.subr.mxu0 %v1063_v0 }
 0x241   :  { %854 = vmatpush3.msra.mxu0 %v519_v35 }
 0x242   :  { %855 = vmatprep.subr.mxu0 %v1063_v0 }
 0x243   :  { %856 = vmatpush3.msra.mxu0 %v518_v36 }
 0x244   :  { %857 = vmatprep.subr.mxu0 %v1063_v0 }
 0x245   :  { %858 = vmatpush3.msra.mxu0 %v517_v37 }
 0x246   :  { %859 = vmatprep.subr.mxu0 %v1063_v0 }
 0x247   :  { %860 = vmatpush3.msra.mxu0 %v516_v38 }
 0x248   :  { %861 = vmatprep.subr.mxu0 %v1063_v0 }
 0x249   :  { %862 = vmatpush3.msra.mxu0 %v515_v39 }
 0x24a   :  { %863 = vmatprep.subr.mxu0 %v1063_v0 }
 0x24b   :  { %864 = vmatpush3.msra.mxu0 %v514_v40 }
 0x24c   :  { %865 = vmatprep.subr.mxu0 %v1063_v0 }
 0x24d   :  { %866 = vmatpush3.msra.mxu0 %v513_v41 }
 0x24e   :  { %867 = vmatprep.subr.mxu0 %v1063_v0 }
 0x24f   :  { %868 = vmatpush3.msra.mxu0 %v512_v42 }
 0x250   :  { %869 = vmatprep.subr.mxu0 %v1063_v0 }
 0x251   :  { %870 = vmatpush3.msra.mxu0 %v511_v43 }
 0x252   :  { %871 = vmatprep.subr.mxu0 %v1063_v0 }
 0x253   :  { %872 = vmatpush3.msra.mxu0 %v510_v44 }
 0x254   :  { %873 = vmatprep.subr.mxu0 %v1063_v0 }
 0x255   :  { %874 = vmatpush3.msra.mxu0 %v509_v45 }
 0x2f6   :  { %v403_v22 = vpop.f32.mrf.mxu0 }
 0x2f7   :  { %v404_v23 = vadd.f32 %v616_v21, %v403_v22 }
 0x2f8   :  { %v807_v24 = vpop.f32.mrf.mxu0 }
 0x2f9   :  { %v407_v25 = vsub.f32 0.0, %v404_v23 }
 0x2fb   :  { %v408_v26 = vmul.f32 1.442695, %v407_v25 }
 0x2fd   :  { %897 = vpow2.f32 %v408_v26 }
 0x30a   :  { %v898_v27 = vpop.eup %897 }
 0x30b   :  { %v410_v28 = vadd.f32 1.0, %v898_v27 }
 0x30d   :  { %899 = vrcp.f32 %v410_v28 }
 0x31a   :  { %v900_v29 = vpop.eup %899 }
 0x31b   :  { %841 = vmatmul.mubr.f32.vlgmr.msra.gmra.mxu1 %v900_v29 }
 0x3db   :  { %v500_v47 = vpop.f32.mrf.mxu1 }
 0x3dc   :  { %v501_v48 = vadd.f32 %v617_v46, %v500_v47 }
 0x3dd   :  { %v842_v49 = vpop.f32.mrf.mxu1 }
 0x3de   :  { %v504_v50 = vsub.f32 0.0, %v501_v48 }
 0x3e0   :  { %v505_v51 = vmul.f32 1.442695, %v504_v50 }
 0x3e2   :  { %901 = vpow2.f32 %v505_v51 }
 0x3ef   :  { %v902_v52 = vpop.eup %901 }
 0x3f0   :  { %v507_v53 = vadd.f32 1.0, %v902_v52 }
 0x3f2   :  { %903 = vrcp.f32 %v507_v53 }
 0x3ff   :  { %v904_v54 = vpop.eup %903 }
 0x400   :  { %876 = vmatmul.mubr.f32.vlgmr.msra.gmra.mxu0 %v904_v54 }
 0x4c0   :  { %v591_v0 = vpop.f32.mrf.mxu0 }
 0x4c1   :  { %595 = vst [vmem:[#allocation13] sm:$0xff] %v591_v0 }
 0x4c2   :  { %v877_v55 = vpop.f32.mrf.mxu0 }
 0x4c3   :  { %1036 = shalt.err (!%p1033_p6)
}
 0x4c4   :  { %605 = dma.vmem_to_hbm [thread:$0]  %s603_s25, 128, %s1269_s10, [#allocation4]  }
 0x4c5   :  { %1053 = dma.done.wait [#allocation4], 128  }
 0x4c6   :  { %1054 = vsyncadd [#allocation4], 4294967168 }
 0x4c7   :  { %609 = vsyncpa [#allocation3], 1 }
 0x4c8   :  { %610 = vsyncpa [#allocation6], 1 }
 0x4c9   :  { %611 = vsyncpa [#allocation9], 1 }
 0x4ca   :  { %612 = vsyncpa [#allocation12], 1 }
 0x4cb   :  { %613 = vsyncpa [#allocation4], 1 }

</bundles_post_ra>
